<compile_context>
chip_gen: v6e
topology: v6e:2x2x1
jax: 0.10.0
libtpu: 0.0.40
codegen_flags: <defaults>
</compile_context>

<pallas_src>
import jax
import jax.numpy as jnp
from jax.experimental import pallas as pl
from jax.experimental.pallas import tpu as pltpu


_HEADS = ("make", "model", "submodel", "generation")


def _nbytes(shape, dtype):
    n = 1
    for s in shape:
        n *= int(s)
    return n * jnp.dtype(dtype).itemsize


def _physical_vmem_bytes():
    # v5e/v6e: 128 MiB per TensorCore; v7x: 64 MiB.  Fall back conservatively.
    try:
        return int(pltpu.get_tpu_info().vmem_capacity_bytes)
    except Exception:  # interpret mode / older runtimes
        return 64 << 20


def _vmem_limit(nbytes):
    # 1.5x headroom + 2 MiB slack, floored at 16 MiB, capped at physical VMEM
    # minus 8 MiB for Pallas internal scratch / semaphores / layout padding.
    cap = _physical_vmem_bytes() - (8 << 20)
    limit = int(nbytes * 1.5) + (2 << 20)
    limit = max(limit, 16 << 20)
    return min(limit, cap)


def _pick_tile(dim, target, quantum=128):
    """Largest tile <= target that divides dim, preferring multiples of 128."""
    t = min(target, dim)
    if t >= dim:
        return dim
    t = max((t // quantum) * quantum, quantum)
    while t > quantum and dim % t != 0:
        t -= quantum
    return t if dim % t == 0 else dim


# ----------------------------------------------------------------------------
# One-time parameter preparation (kept OUT of the per-call path).
# ----------------------------------------------------------------------------
def prepare_params(params):
    prep = {
        "w1": params["w1"].astype(jnp.bfloat16),
        "b1": params["b1"].reshape(1, -1).astype(jnp.float32),
        "w2": params["w2"].astype(jnp.bfloat16),
        "b2": params["b2"].reshape(1, -1).astype(jnp.float32),
    }
    widths = tuple(int(params[f"w_{h}"].shape[1]) for h in _HEADS)
    n_total = sum(widths)
    n_pad = -(-n_total // 128) * 128                # lane-dense head width
    w_cat = jnp.concatenate([params[f"w_{h}"] for h in _HEADS], axis=1)
    b_cat = jnp.concatenate([params[f"b_{h}"] for h in _HEADS], axis=0)
    prep["w_heads"] = jnp.pad(w_cat, ((0, 0), (0, n_pad - n_total))).astype(jnp.bfloat16)
    prep["b_heads"] = jnp.pad(b_cat, (0, n_pad - n_total)).reshape(1, -1).astype(jnp.float32)
    prep["head_widths"] = widths
    return prep


# ----------------------------------------------------------------------------
# Kernel 1: FC1   h1 = relu(x @ W1 + b1)
#   bf16 inputs, f32 VMEM accumulator, bf16 output.
#   Grid = (N tiles [parallel -> megacore], K tiles [reduction, last]).
#   x is fully resident in VMEM (constant block index across the whole grid).
# ----------------------------------------------------------------------------
def _linear_relu_kernel(x_ref, w_ref, b_ref, o_ref, acc_ref):
    n = pl.program_id(0)
    k = pl.program_id(1)

    @pl.when(k == 0)
    def _():
        acc_ref[...] = jnp.zeros_like(acc_ref)

    acc_ref[...] += jnp.dot(
        x_ref[:, pl.ds(k * w_ref.shape[0], w_ref.shape[0])],
        w_ref[...],
        preferred_element_type=jnp.float32,
    )

    @pl.when(k == pl.num_programs(1) - 1)
    def _():
        o_ref[...] = jnp.maximum(acc_ref[...] + b_ref[...], 0.0).astype(o_ref.dtype)
    del n


def linear_relu(x, w, b2d, *, tk=3584, tn=1024, out_dtype=jnp.bfloat16):
    B, K = x.shape
    Kw, N = w.shape
    assert K == Kw
    tk = _pick_tile(K, tk)
    tn = _pick_tile(N, tn)
    assert K % tk == 0 and N % tn == 0, (K, tk, N, tn)

    vmem = (_nbytes((B, K), x.dtype)             # x fully resident
            + 2 * _nbytes((tk, tn), w.dtype)     # W double-buffered
            + 2 * _nbytes((8, tn), jnp.float32)  # bias (sublane 1 pads to 8)
            + 2 * _nbytes((B, tn), out_dtype)    # output
            + _nbytes((B, tn), jnp.float32))     # accumulator scratch

    cost = pl.CostEstimate(
        flops=2 * B * K * N,
        transcendentals=0,
        bytes_accessed=(_nbytes((K, N), w.dtype) + _nbytes((B, K), x.dtype)
                        + _nbytes((B, N), out_dtype) + _nbytes((1, N), jnp.float32)),
    )

    return pl.pallas_call(
        _linear_relu_kernel,
        out_shape=jax.ShapeDtypeStruct((B, N), out_dtype),
        grid_spec=pltpu.PrefetchScalarGridSpec(
            num_scalar_prefetch=0,
            grid=(N // tn, K // tk),
            in_specs=[
                pl.BlockSpec((B, K), lambda n, k: (0, 0)),    # x : resident
                pl.BlockSpec((tk, tn), lambda n, k: (k, n)),  # W : walk K and N
                pl.BlockSpec((1, tn), lambda n, k: (0, n)),   # b : per N tile
            ],
            out_specs=pl.BlockSpec((B, tn), lambda n, k: (0, n)),
            scratch_shapes=[pltpu.VMEM((B, tn), jnp.float32)],
        ),
        compiler_params=pltpu.CompilerParams(
            dimension_semantics=("parallel", "arbitrary"),
            vmem_limit_bytes=_vmem_limit(vmem),
        ),
        cost_estimate=cost,
    )(x, w, b2d)


# ----------------------------------------------------------------------------
# Kernel 2: fused FC2 + ReLU + concatenated heads.
#   For each FC2 output-column tile n:
#     h2_n = relu(h1 @ W2[:, n] + b2[n])        (full-K dot, h1 resident)
#     out += h2_n @ W_heads[n, :]               (heads reduce over FC2 cols)
#   A leading "parallel" axis of size n_split gives each v7x TensorCore its
#   own half of the FC2 columns and a private (B, Nh) partial; the wrapper
#   sums the partials and adds the head bias (tiny epilogue).
#
#   NOTE: ReLU before the head matmul is only correct because the FC2
#   reduction dim H is fully resident (never tiled).  Do NOT tile H.
# ----------------------------------------------------------------------------
def _fc2_heads_kernel(h_ref, w2_ref, b2_ref, wh_ref, o_ref):
    n = pl.program_id(1)

    @pl.when(n == 0)
    def _():
        o_ref[...] = jnp.zeros_like(o_ref)

    h2 = jnp.maximum(
        jnp.dot(h_ref[...], w2_ref[...], preferred_element_type=jnp.float32)
        + b2_ref[...],
        0.0,
    )
    o_ref[...] += jnp.dot(h2.astype(jnp.bfloat16), wh_ref[...],
                          preferred_element_type=jnp.float32)


def fc2_heads(h1, w2, b2d, w_heads, bh2d, *, tn=1024):
    B, H = h1.shape
    Hw, N2 = w2.shape
    assert H == Hw  # full-H residency required (see kernel note on ReLU)
    N2h, Nh = w_heads.shape
    assert N2h == N2
    assert Nh % 128 == 0, "concatenated head width must be lane-dense (pad to 128)"
    tn = _pick_tile(N2, tn)
    assert N2 % tn == 0, (N2, tn)

    n_tiles = N2 // tn
    n_split = 2 if (n_tiles >= 2 and n_tiles % 2 == 0) else 1
    n_per = n_tiles // n_split

    vmem = (_nbytes((B, H), h1.dtype)                 # resident h1
            + 2 * _nbytes((H, tn), w2.dtype)          # W2 tile double-buffered
            + 2 * _nbytes((8, tn), jnp.float32)       # b2 (sublane 1 pads to 8)
            + 2 * _nbytes((tn, Nh), w_heads.dtype)    # head-weight tile
            + _nbytes((B, Nh), jnp.float32))          # resident output/accumulator

    cost = pl.CostEstimate(
        flops=2 * B * H * N2 + 2 * B * N2 * Nh,
        transcendentals=0,
        bytes_accessed=(_nbytes((H, N2), w2.dtype) + _nbytes((N2, Nh), w_heads.dtype)
                        + _nbytes((B, H), h1.dtype)
                        + n_split * _nbytes((B, Nh), jnp.float32)),
    )

    partials = pl.pallas_call(
        _fc2_heads_kernel,
        out_shape=jax.ShapeDtypeStruct((n_split, B, Nh), jnp.float32),
        grid_spec=pltpu.PrefetchScalarGridSpec(
            num_scalar_prefetch=0,
            grid=(n_split, n_per),
            in_specs=[
                pl.BlockSpec((B, H), lambda p, n: (0, 0)),             # h1 resident
                pl.BlockSpec((H, tn), lambda p, n: (0, p * n_per + n)),  # W2 cols
                pl.BlockSpec((1, tn), lambda p, n: (0, p * n_per + n)),  # b2
                pl.BlockSpec((tn, Nh), lambda p, n: (p * n_per + n, 0)),  # head W
            ],
            out_specs=pl.BlockSpec((None, B, Nh), lambda p, n: (p, 0, 0)),
        ),
        compiler_params=pltpu.CompilerParams(
            dimension_semantics=("parallel", "arbitrary"),
            vmem_limit_bytes=_vmem_limit(vmem),
        ),
        cost_estimate=cost,
    )(h1, w2, b2d, w_heads)

    # Tiny epilogue: sum per-core partials, add the concatenated head bias.
    return partials.sum(axis=0) + bh2d


# ----------------------------------------------------------------------------
# Full module forward (expects prepare_params() output).
# ----------------------------------------------------------------------------
def mtlc_forward(x, prep):
    B = x.shape[0]
    feat = x.reshape(B, -1)  # synthetic `base` feature extractor: flatten NCHW

    # Pad batch to a full sublane group (8 rows) for dense sublane layouts.
    Bp = -(-B // 8) * 8
    if Bp != B:
        feat = jnp.pad(feat, ((0, Bp - B), (0, 0)))
    feat = feat.astype(jnp.bfloat16)

    # classifier[0..5]: Linear->ReLU->(Dropout)->Linear->ReLU->(Dropout),
    # with FC2 fused together with the four heads in a single pallas_call.
    h1 = linear_relu(feat, prep["w1"], prep["b1"])
    heads = fc2_heads(h1, prep["w2"], prep["b2"], prep["w_heads"], prep["b_heads"])

    outs = []
    off = 0
    for wdt in prep["head_widths"]:
        outs.append(heads[:B, off:off + wdt])
        off += wdt
    return tuple(outs)


def init_params(key, d_in, hidden, num_makes, num_models, num_submodels,
                num_generation):
    ks = jax.random.split(key, 12)

    def lin(kw, kb, fan_in, fan_out):
        bound = 1.0 / jnp.sqrt(fan_in)
        w = jax.random.uniform(kw, (fan_in, fan_out), jnp.float32, -bound, bound)
        b = jax.random.uniform(kb, (fan_out,), jnp.float32, -bound, bound)
        return w, b

    p = {}
    p["w1"], p["b1"] = lin(ks[0], ks[1], d_in, hidden)
    p["w2"], p["b2"] = lin(ks[2], ks[3], hidden, hidden)
    p["w_make"], p["b_make"] = lin(ks[4], ks[5], hidden, num_makes)
    p["w_model"], p["b_model"] = lin(ks[6], ks[7], hidden, num_models)
    p["w_submodel"], p["b_submodel"] = lin(ks[8], ks[9], hidden, num_submodels)
    p["w_generation"], p["b_generation"] = lin(ks[10], ks[11], hidden,
                                               num_generation)
    return p


def ref_forward(x, params):
    """Pure-JAX reference mirroring the kernels' bf16 storage rounding."""
    def q(a):
        return a.astype(jnp.bfloat16).astype(jnp.float32)

    B = x.shape[0]
    feat = q(x.reshape(B, -1).astype(jnp.float32))
    h1 = q(jnp.maximum(feat @ q(params["w1"]) + params["b1"], 0.0))
    h2 = q(jnp.maximum(h1 @ q(params["w2"]) + params["b2"], 0.0))
    return tuple(h2 @ q(params[f"w_{h}"]) + params[f"b_{h}"] for h in _HEADS)


if __name__ == "__main__":
    # Small shapes consistent with the module (scaled: 25088->1024, 4096->256).
    B, C, Hs, Ws = 2, 4, 16, 16
    d_in = C * Hs * Ws          # 1024
    hidden = 256
    num_makes, num_models, num_submodels, num_generation = 16, 24, 40, 12

    key = jax.random.PRNGKey(0)
    kx, kp = jax.random.split(key)
    x = jax.random.normal(kx, (B, C, Hs, Ws), jnp.float32)
    params = init_params(kp, d_in, hidden,
                         num_makes, num_models, num_submodels, num_generation)

    # One-time weight preprocessing (cast / concat / pad) outside the call path.
    prep = jax.block_until_ready(prepare_params(params))

    outs = jax.block_until_ready(mtlc_forward(x, prep))
    refs = ref_forward(x, params)

    for o, r in zip(outs, refs):
        assert o.shape == r.shape, (o.shape, r.shape)
        assert o.dtype == jnp.float32
        assert jnp.allclose(o, r, atol=2e-2, rtol=2e-2), \
            float(jnp.max(jnp.abs(o - r)))

    print("KERNEL_OK")
</pallas_src>

<mosaic_0001>
module attributes {stable_mosaic.version = 11 : i64} {
  func.func @_linear_relu_kernel(%arg0: i32, %arg1: i32, %arg2: memref<8x1024xbf16, #tpu.memory_space<vmem>>, %arg3: memref<1024x256xbf16, #tpu.memory_space<vmem>>, %arg4: memref<1x256xf32, #tpu.memory_space<vmem>>, %arg5: memref<8x256xbf16, #tpu.memory_space<vmem>>, %arg6: memref<8x256xf32, #tpu.memory_space<vmem>>) attributes {dimension_semantics = [#tpu.dimension_semantics<parallel>, #tpu.dimension_semantics<arbitrary>], iteration_bounds = array<i64: 1, 1>, scalar_prefetch = 0 : i64, scratch_operands = 1 : i64, tpu.core_type = #tpu.core_type<tc>, window_params = [{pipeline_mode = #tpu.pipeline_mode<synchronous>, transform_indices = @transform_0, window_bounds = array<i64: 8, 1024>}, {transform_indices = @transform_1, window_bounds = array<i64: 1024, 256>}, {transform_indices = @transform_2, window_bounds = array<i64: 1, 256>}, {transform_indices = @transform_3, window_bounds = array<i64: 8, 256>}]} {
    %c0_i32 = arith.constant 0 : i32
    %0 = arith.cmpi eq, %arg1, %c0_i32 : i32
    %1 = arith.extui %0 : i1 to i32
    %c0_i32_0 = arith.constant 0 : i32
    %2 = arith.cmpi ne, %1, %c0_i32_0 : i32
    scf.if %2 {
      %cst_9 = arith.constant 0.000000e+00 : f32
      %14 = vector.broadcast %cst_9 : f32 to vector<8x256xf32>
      %c0_10 = arith.constant 0 : index
      %c0_11 = arith.constant 0 : index
      %15 = vector.load %arg6[%c0_10, %c0_11] : memref<8x256xf32, #tpu.memory_space<vmem>>, vector<8x256xf32>
      tpu.vector_store %arg6[%c0_10, %c0_11], %14 {strides = array<i32>} : memref<8x256xf32, #tpu.memory_space<vmem>>, vector<8x256xf32>,
    } else {
    }
    %c0 = arith.constant 0 : index
    %c0_1 = arith.constant 0 : index
    %3 = vector.load %arg6[%c0, %c0_1] : memref<8x256xf32, #tpu.memory_space<vmem>>, vector<8x256xf32>
    %c1024_i32 = arith.constant 1024 : i32
    %4 = arith.muli %arg1, %c1024_i32 : i32
    %c0_2 = arith.constant 0 : index
    %5 = arith.index_cast %4 : i32 to index
    %6 = vector.load %arg2[%c0_2, %5] : memref<8x1024xbf16, #tpu.memory_space<vmem>>, vector<8x1024xbf16>
    %c0_3 = arith.constant 0 : index
    %c0_4 = arith.constant 0 : index
    %7 = vector.load %arg3[%c0_3, %c0_4] : memref<1024x256xbf16, #tpu.memory_space<vmem>>, vector<1024x256xbf16>
    %cst = arith.constant dense<0.000000e+00> : vector<8x256xf32>
    %8 = tpu.matmul %6, %7, %cst {dimension_numbers = #tpu.dot_dimension_numbers<[1], [0], [0], [1], [0, 0, 1, 1], [], []>} : vector<8x1024xbf16>, vector<1024x256xbf16>, vector<8x256xf32> -> vector<8x256xf32>
    %9 = arith.addf %3, %8 : vector<8x256xf32>
    %c0_5 = arith.constant 0 : index
    %c0_6 = arith.constant 0 : index
    %10 = vector.load %arg6[%c0_5, %c0_6] : memref<8x256xf32, #tpu.memory_space<vmem>>, vector<8x256xf32>
    tpu.vector_store %arg6[%c0_5, %c0_6], %9 {strides = array<i32>} : memref<8x256xf32, #tpu.memory_space<vmem>>, vector<8x256xf32>,
    %c0_i32_7 = arith.constant 0 : i32
    %11 = arith.cmpi eq, %arg1, %c0_i32_7 : i32
    %12 = arith.extui %11 : i1 to i32
    %c0_i32_8 = arith.constant 0 : i32
    %13 = arith.cmpi ne, %12, %c0_i32_8 : i32
    scf.if %13 {
      %c0_9 = arith.constant 0 : index
      %c0_10 = arith.constant 0 : index
      %14 = vector.load %arg6[%c0_9, %c0_10] : memref<8x256xf32, #tpu.memory_space<vmem>>, vector<8x256xf32>
      %c0_11 = arith.constant 0 : index
      %c0_12 = arith.constant 0 : index
      %15 = vector.load %arg4[%c0_11, %c0_12] : memref<1x256xf32, #tpu.memory_space<vmem>>, vector<1x256xf32>
      %16 = vector.broadcast %15 : vector<1x256xf32> to vector<8x256xf32>
      %17 = arith.addf %14, %16 : vector<8x256xf32>
      %cst_13 = arith.constant 0.000000e+00 : f32
      %18 = vector.broadcast %cst_13 : f32 to vector<8x256xf32>
      %19 = arith.maximumf %17, %18 : vector<8x256xf32>
      %20 = arith.truncf %19 : vector<8x256xf32> to vector<8x256xbf16>
      %c0_14 = arith.constant 0 : index
      %c0_15 = arith.constant 0 : index
      %21 = vector.load %arg5[%c0_14, %c0_15] : memref<8x256xbf16, #tpu.memory_space<vmem>>, vector<8x256xbf16>
      tpu.vector_store %arg5[%c0_14, %c0_15], %20 {strides = array<i32>} : memref<8x256xbf16, #tpu.memory_space<vmem>>, vector<8x256xbf16>,
    } else {
    }
    return
  }
  func.func @transform_0(%arg0: i32, %arg1: i32) -> (i32, i32) {
    %c0_i32 = arith.constant 0 : i32
    %c0_i32_0 = arith.constant 0 : i32
    %c0_i32_1 = arith.constant 0 : i32
    return %c0_i32, %c0_i32_0 : i32, i32
  }
  func.func @transform_1(%arg0: i32, %arg1: i32) -> (i32, i32) {
    %c0_i32 = arith.constant 0 : i32
    return %arg1, %arg0 : i32, i32
  }
  func.func @transform_2(%arg0: i32, %arg1: i32) -> (i32, i32) {
    %c0_i32 = arith.constant 0 : i32
    %c0_i32_0 = arith.constant 0 : i32
    return %c0_i32, %arg0 : i32, i32
  }
  func.func @transform_3(%arg0: i32, %arg1: i32) -> (i32, i32) {
    %c0_i32 = arith.constant 0 : i32
    %c0_i32_0 = arith.constant 0 : i32
    return %c0_i32, %arg0 : i32, i32
  }
}

</mosaic_0001>

<bundles_post_ra>
// kernel: tpu_custom_call.1
= control target key start
LH: loop header
LB: loop body
LE: loop exit
PB: predicated region body
PF: predicated region fallthrough
CT: control target
= control target key end

     0   :  { %8 = vsyncpa [#allocation4], 0  ;;  %s1528_s0 = inlined_call_operand.hbm [shape: bf16[8,1024], index: 0, kind: input, shape index: {}]   ;;  %s1529_s1 = inlined_call_operand.hbm [shape: bf16[1024,256], index: 1, kind: input, shape index: {}]   ;;  %s1530_s2 = inlined_call_operand.vmem [shape: f32[1,256], index: 2, kind: input, shape index: {}]   ;;  %s1531_s3 = inlined_call_operand.hbm [shape: bf16[8,256], index: 3, kind: output, shape index: {}]  }
   0x1   :  { %9 = vsyncpa [#allocation7], 0 }
   0x2   :  { %10 = vsyncpa [#allocation5], 0  ;;  %s1479_s12 = smov [#allocation3]   ;;  %s1480_s14 = smov [#allocation6]  }
   0x3   :  { %s17_s13 = sshll.u32 %s1479_s12, 4  ;;  %s26_s15 = sshll.u32 %s1480_s14, 4  ;;  %s18_s13 = int_to_ptr.vmem [resolvable:$true] %s17_s13  ;;  %s27_s15 = int_to_ptr.vmem [resolvable:$true] %s26_s15 }
   0x4   :  { %s1421_s16 = scalar_lea.vmem %s18_s13, 512  ;;  %p1426_p1 = scmp.lt.s32.totalorder %s18_s13, %s18_s13 }
   0x5   :  { %p1422_p0 = scmp.ne.s32.totalorder %s18_s13, %s1421_s16  ;;  %p1427_p2 = scmp.lt.s32.totalorder %s1421_s16, %s1421_s16 }
   0x7   :  { %p1428_p3 = por %p1427_p2, %p1426_p1 }
   0x9   :  { %p1429_p4 = pnand %p1428_p3, %p1422_p0 }
   0xb   :  { %1432 = shalt.err (!%p1429_p4)
}
   0xc   :  { %20 = dma.hbm_to_vmem [thread:$0]  %s1528_s0, 512, %s18_s13, [#allocation4]  }
   0xd   :  { %s1441_s19 = scalar_lea.vmem %s27_s15, 16384  ;;  %p1446_p6 = scmp.lt.s32.totalorder %s27_s15, %s27_s15 }
   0xe   :  { %p1442_p5 = scmp.ne.s32.totalorder %s27_s15, %s1441_s19  ;;  %p1447_p7 = scmp.lt.s32.totalorder %s1441_s19, %s1441_s19 }
  0x10   :  { %p1448_p8 = por %p1447_p7, %p1446_p6 }
  0x12   :  { %p1449_p9 = pnand %p1448_p8, %p1442_p5 }
  0x14   :  { %1452 = shalt.err (!%p1449_p9)
}
  0x15   :  { %s1481_s20 = smov 128   ;;  %s1482_s21 = smov 8  }
  0x16   :  { %32 = dma.hbm_to_vmem [thread:$0]  %s1529_s1, 16384, %s27_s15, [#allocation7], %s1481_s20, %s1481_s20, %s1482_s21  }
  0x17   :  { %1473 = dma.done.wait [#allocation4], 512  }
  0x18   :  { %1474 = vsyncadd [#allocation4], 4294966784 }
  0x19   :  { %1475 = dma.done.wait [#allocation7], 16384  }
  0x1a   :  { %1476 = vsyncadd [#allocation7], 4294950912  ;;  %v1213_v0 = vld [vmem:[#allocation6 + $0x74] ss:$8 sps:$4 sm:$0xff]   ;;  %v1217_v2 = vld [vmem:[#allocation6 + $0x70] ss:$8 sps:$4 sm:$0xff]  }
  0x1b   :  { %v1215_v1 = vld [vmem:[#allocation6 + $0x174] ss:$8 sps:$4 sm:$0xff]   ;;  %854 = vmatprep.subr.bf16.mxu0 %v1213_v0  ;;  %v1218_v3 = vld [vmem:[#allocation6 + $0x170] ss:$8 sps:$4 sm:$0xff]   ;;  %v1219_v4 = vld [vmem:[#allocation6 + $0x64] ss:$8 sps:$4 sm:$0xff]  }
  0x1c   :  { %895 = vmatprep.subr.bf16.mxu1 %v1215_v1  ;;  %855 = vmatpush1.bf16.msra.mxu0 %v1217_v2  ;;  %v1221_v5 = vld [vmem:[#allocation6 + $0x164] ss:$8 sps:$4 sm:$0xff]   ;;  %v1223_v6 = vld [vmem:[#allocation6 + $0x60] ss:$8 sps:$4 sm:$0xff]   ;;  %v1225_v8 = vld [vmem:[#allocation6 + $0x54] ss:$8 sps:$4 sm:$0xff]  }
  0x1d   :  { %896 = vmatpush1.bf16.msra.mxu1 %v1218_v3  ;;  %856 = vmatprep.subr.bf16.mxu0 %v1219_v4  ;;  %v1224_v7 = vld [vmem:[#allocation6 + $0x160] ss:$8 sps:$4 sm:$0xff]   ;;  %v1227_v9 = vld [vmem:[#allocation6 + $0x154] ss:$8 sps:$4 sm:$0xff]   ;;  %v1229_v10 = vld [vmem:[#allocation6 + $0x50] ss:$8 sps:$4 sm:$0xff]  }
  0x1e   :  { %897 = vmatprep.subr.bf16.mxu1 %v1221_v5  ;;  %v1230_v11 = vld [vmem:[#allocation6 + $0x150] ss:$8 sps:$4 sm:$0xff]   ;;  %v1231_v12 = vld [vmem:[#allocation6 + $0x44] ss:$8 sps:$4 sm:$0xff]   ;;  %v1235_v14 = vld [vmem:[#allocation6 + $0x40] ss:$8 sps:$4 sm:$0xff]  }
  0x1f   :  { %v1233_v13 = vld [vmem:[#allocation6 + $0x144] ss:$8 sps:$4 sm:$0xff]   ;;  %v1236_v15 = vld [vmem:[#allocation6 + $0x140] ss:$8 sps:$4 sm:$0xff]   ;;  %v1237_v16 = vld [vmem:[#allocation6 + $0x34] ss:$8 sps:$4 sm:$0xff]  }
  0x20   :  { %857 = vmatpush1.bf16.msra.mxu0 %v1223_v6  ;;  %v1239_v17 = vld [vmem:[#allocation6 + $0x134] ss:$8 sps:$4 sm:$0xff]   ;;  %v1241_v18 = vld [vmem:[#allocation6 + $0x30] ss:$8 sps:$4 sm:$0xff]   ;;  %v1243_v20 = vld [vmem:[#allocation6 + $0x24] ss:$8 sps:$4 sm:$0xff]  }
  0x21   :  { %898 = vmatpush1.bf16.msra.mxu1 %v1224_v7  ;;  %858 = vmatprep.subr.bf16.mxu0 %v1225_v8  ;;  %v1242_v19 = vld [vmem:[#allocation6 + $0x130] ss:$8 sps:$4 sm:$0xff]   ;;  %v1245_v21 = vld [vmem:[#allocation6 + $0x124] ss:$8 sps:$4 sm:$0xff]   ;;  %v1247_v22 = vld [vmem:[#allocation6 + $0x20] ss:$8 sps:$4 sm:$0xff]  }
  0x22   :  { %899 = vmatprep.subr.bf16.mxu1 %v1227_v9  ;;  %v1248_v23 = vld [vmem:[#allocation6 + $0x120] ss:$8 sps:$4 sm:$0xff]   ;;  %v1249_v24 = vld [vmem:[#allocation6 + $0x14] ss:$8 sps:$4 sm:$0xff]   ;;  %v1253_v26 = vld [vmem:[#allocation6 + $0x10] ss:$8 sps:$4 sm:$0xff]  }
  0x23   :  { %v1251_v25 = vld [vmem:[#allocation6 + $0x114] ss:$8 sps:$4 sm:$0xff]   ;;  %v1254_v27 = vld [vmem:[#allocation6 + $0x110] ss:$8 sps:$4 sm:$0xff]   ;;  %v1255_v28 = vld [vmem:[#allocation6 + $0x4] ss:$8 sps:$4 sm:$0xff]  }
  0x24   :  { %859 = vmatpush1.bf16.msra.mxu0 %v1229_v10  ;;  %v1257_v29 = vld [vmem:[#allocation6 + $0x104] ss:$8 sps:$4 sm:$0xff]   ;;  %v1259_v30 = vld [vmem:[#allocation6] ss:$8 sps:$4 sm:$0xff]   ;;  %v1261_v32 = vld [vmem:[#allocation6 + $0xf4] ss:$8 sps:$4 sm:$0xff]  }
  0x25   :  { %900 = vmatpush1.bf16.msra.mxu1 %v1230_v11  ;;  %860 = vmatprep.subr.bf16.mxu0 %v1231_v12  ;;  %v1260_v31 = vld [vmem:[#allocation6 + $0x100] ss:$8 sps:$4 sm:$0xff]   ;;  %v1263_v33 = vld [vmem:[#allocation6 + $0x1f4] ss:$8 sps:$4 sm:$0xff]   ;;  %v1265_v34 = vld [vmem:[#allocation6 + $0xf0] ss:$8 sps:$4 sm:$0xff]  }
  0x26   :  { %901 = vmatprep.subr.bf16.mxu1 %v1233_v13  ;;  %v1266_v35 = vld [vmem:[#allocation6 + $0x1f0] ss:$8 sps:$4 sm:$0xff]   ;;  %v1267_v36 = vld [vmem:[#allocation6 + $0xe4] ss:$8 sps:$4 sm:$0xff]   ;;  %v1271_v38 = vld [vmem:[#allocation6 + $0xe0] ss:$8 sps:$4 sm:$0xff]  }
  0x27   :  { %v1269_v37 = vld [vmem:[#allocation6 + $0x1e4] ss:$8 sps:$4 sm:$0xff]   ;;  %v1272_v39 = vld [vmem:[#allocation6 + $0x1e0] ss:$8 sps:$4 sm:$0xff]   ;;  %v1273_v40 = vld [vmem:[#allocation6 + $0xd4] ss:$8 sps:$4 sm:$0xff]  }
  0x28   :  { %861 = vmatpush1.bf16.msra.mxu0 %v1235_v14  ;;  %v1275_v41 = vld [vmem:[#allocation6 + $0x1d4] ss:$8 sps:$4 sm:$0xff]   ;;  %v1277_v42 = vld [vmem:[#allocation6 + $0xd0] ss:$8 sps:$4 sm:$0xff]   ;;  %v1279_v44 = vld [vmem:[#allocation6 + $0xc4] ss:$8 sps:$4 sm:$0xff]  }
  0x29   :  { %902 = vmatpush1.bf16.msra.mxu1 %v1236_v15  ;;  %862 = vmatprep.subr.bf16.mxu0 %v1237_v16  ;;  %v1278_v43 = vld [vmem:[#allocation6 + $0x1d0] ss:$8 sps:$4 sm:$0xff]   ;;  %v1281_v45 = vld [vmem:[#allocation6 + $0x1c4] ss:$8 sps:$4 sm:$0xff]   ;;  %v1283_v49 = vld [vmem:[#allocation6 + $0xc0] ss:$8 sps:$4 sm:$0xff]  }
  0x2a   :  { %903 = vmatprep.subr.bf16.mxu1 %v1239_v17  ;;  %v54_v46 = vld [vmem:[#allocation3] sm:$0xff]  ;;  %v55_v48 = vld [vmem:[#allocation3 + $0x8] sm:$0xff]  ;;  %v1285_v52 = vld [vmem:[#allocation6 + $0xb4] ss:$8 sps:$4 sm:$0xff]   ;;  %s1483_s24 = smov [#allocation8]  }
  0x2b   :  { %v1071_v47 = vcombine.high %v54_v46, %v54_v46  ;;  %v1284_v50 = vld [vmem:[#allocation6 + $0x1c0] ss:$8 sps:$4 sm:$0xff]   ;;  %v1073_v51 = vcombine.high %v55_v48, %v55_v48  ;;  %v1287_v53 = vld [vmem:[#allocation6 + $0x1b4] ss:$8 sps:$4 sm:$0xff]   ;;  %v1289_v54 = vld [vmem:[#allocation6 + $0xb0] ss:$8 sps:$4 sm:$0xff]   ;;  %v1070_v6 = vcombine.low %v54_v46, %v54_v46  ;;  %v1072_v7 = vcombine.low %v55_v48, %v55_v48 }
  0x2c   :  { %863 = vmatpush1.bf16.msra.mxu0 %v1241_v18  ;;  %v1290_v55 = vld [vmem:[#allocation6 + $0x1b0] ss:$8 sps:$4 sm:$0xff]   ;;  %v1291_v56 = vld [vmem:[#allocation6 + $0xa4] ss:$8 sps:$4 sm:$0xff]   ;;  %v1295_v58 = vld [vmem:[#allocation6 + $0xa0] ss:$8 sps:$4 sm:$0xff]  }
  0x2d   :  { %904 = vmatpush1.bf16.msra.mxu1 %v1242_v19  ;;  %864 = vmatprep.subr.bf16.mxu0 %v1243_v20  ;;  %v1293_v57 = vld [vmem:[#allocation6 + $0x1a4] ss:$8 sps:$4 sm:$0xff]   ;;  %v1296_v59 = vld [vmem:[#allocation6 + $0x1a0] ss:$8 sps:$4 sm:$0xff]   ;;  %v1297_v60 = vld [vmem:[#allocation6 + $0x94] ss:$8 sps:$4 sm:$0xff]  }
  0x2e   :  { %905 = vmatprep.subr.bf16.mxu1 %v1245_v21  ;;  %886 = vmatprep.mubr.bf16.mxu0 %v1071_v47  ;;  %v1299_v61 = vld [vmem:[#allocation6 + $0x194] ss:$8 sps:$4 sm:$0xff]   ;;  %v1301_v62 = vld [vmem:[#allocation6 + $0x90] ss:$8 sps:$4 sm:$0xff]   ;;  %v1303_v0 = vld [vmem:[#allocation6 + $0x84] ss:$8 sps:$4 sm:$0xff]  }
  0x2f   :  { %927 = vmatprep.mubr.bf16.mxu1 %v1073_v51  ;;  %v1302_v63 = vld [vmem:[#allocation6 + $0x190] ss:$8 sps:$4 sm:$0xff]   ;;  %v1305_v1 = vld [vmem:[#allocation6 + $0x184] ss:$8 sps:$4 sm:$0xff]   ;;  %v1307_v2 = vld [vmem:[#allocation6 + $0x80] ss:$8 sps:$4 sm:$0xff]  }
  0x30   :  { %865 = vmatpush1.bf16.msra.mxu0 %v1247_v22  ;;  %v1308_v3 = vld [vmem:[#allocation6 + $0x180] ss:$8 sps:$4 sm:$0xff]   ;;  %v1315_v4 = vld [vmem:[#allocation6 + $0x274] ss:$8 sps:$4 sm:$0xff]   ;;  %v1313_v8 = vld [vmem:[#allocation6 + $0x270] ss:$8 sps:$4 sm:$0xff]  }
  0x31   :  { %906 = vmatpush1.bf16.msra.mxu1 %v1248_v23  ;;  %866 = vmatprep.subr.bf16.mxu0 %v1249_v24  ;;  %v1318_v5 = vld [vmem:[#allocation6 + $0x374] ss:$8 sps:$4 sm:$0xff]   ;;  %v1316_v9 = vld [vmem:[#allocation6 + $0x370] ss:$8 sps:$4 sm:$0xff]   ;;  %v1321_v10 = vld [vmem:[#allocation6 + $0x264] ss:$8 sps:$4 sm:$0xff]  }
  0x32   :  { %907 = vmatprep.subr.bf16.mxu1 %v1251_v25  ;;  %v1324_v11 = vld [vmem:[#allocation6 + $0x364] ss:$8 sps:$4 sm:$0xff]   ;;  %v1319_v12 = vld [vmem:[#allocation6 + $0x260] ss:$8 sps:$4 sm:$0xff]   ;;  %v1327_v14 = vld [vmem:[#allocation6 + $0x254] ss:$8 sps:$4 sm:$0xff]  }
  0x33   :  { %v1322_v13 = vld [vmem:[#allocation6 + $0x360] ss:$8 sps:$4 sm:$0xff]   ;;  %v1330_v15 = vld [vmem:[#allocation6 + $0x354] ss:$8 sps:$4 sm:$0xff]   ;;  %v1325_v16 = vld [vmem:[#allocation6 + $0x250] ss:$8 sps:$4 sm:$0xff]  }
  0x34   :  { %867 = vmatpush1.bf16.msra.mxu0 %v1253_v26  ;;  %v1328_v17 = vld [vmem:[#allocation6 + $0x350] ss:$8 sps:$4 sm:$0xff]   ;;  %v1333_v18 = vld [vmem:[#allocation6 + $0x244] ss:$8 sps:$4 sm:$0xff]   ;;  %v1331_v20 = vld [vmem:[#allocation6 + $0x240] ss:$8 sps:$4 sm:$0xff]  }
  0x35   :  { %908 = vmatpush1.bf16.msra.mxu1 %v1254_v27  ;;  %868 = vmatprep.subr.bf16.mxu0 %v1255_v28  ;;  %v1336_v19 = vld [vmem:[#allocation6 + $0x344] ss:$8 sps:$4 sm:$0xff]   ;;  %v1334_v21 = vld [vmem:[#allocation6 + $0x340] ss:$8 sps:$4 sm:$0xff]   ;;  %v1339_v22 = vld [vmem:[#allocation6 + $0x234] ss:$8 sps:$4 sm:$0xff]  }
  0x36   :  { %909 = vmatprep.subr.bf16.mxu1 %v1257_v29  ;;  %v1342_v23 = vld [vmem:[#allocation6 + $0x334] ss:$8 sps:$4 sm:$0xff]   ;;  %v1337_v24 = vld [vmem:[#allocation6 + $0x230] ss:$8 sps:$4 sm:$0xff]   ;;  %v1345_v26 = vld [vmem:[#allocation6 + $0x224] ss:$8 sps:$4 sm:$0xff]  }
  0x37   :  { %v1340_v25 = vld [vmem:[#allocation6 + $0x330] ss:$8 sps:$4 sm:$0xff]   ;;  %v1348_v27 = vld [vmem:[#allocation6 + $0x324] ss:$8 sps:$4 sm:$0xff]   ;;  %v1343_v28 = vld [vmem:[#allocation6 + $0x220] ss:$8 sps:$4 sm:$0xff]  }
  0x38   :  { %869 = vmatpush1.bf16.msra.mxu0 %v1259_v30  ;;  %v1346_v29 = vld [vmem:[#allocation6 + $0x320] ss:$8 sps:$4 sm:$0xff]   ;;  %v1351_v30 = vld [vmem:[#allocation6 + $0x214] ss:$8 sps:$4 sm:$0xff]   ;;  %v1369_v46 = vld [vmem:[#allocation6 + $0x2e4] ss:$8 sps:$4 sm:$0xff]  }
  0x39   :  { %910 = vmatpush1.bf16.msra.mxu1 %v1260_v31  ;;  %870 = vmatprep.subr.bf16.mxu0 %v1261_v32  ;;  %v1354_v31 = vld [vmem:[#allocation6 + $0x314] ss:$8 sps:$4 sm:$0xff]   ;;  %v1372_v47 = vld [vmem:[#allocation6 + $0x3e4] ss:$8 sps:$4 sm:$0xff]   ;;  %v1367_v48 = vld [vmem:[#allocation6 + $0x2e0] ss:$8 sps:$4 sm:$0xff]  }
  0x3a   :  { %911 = vmatprep.subr.bf16.mxu1 %v1263_v33  ;;  %v1510_v32 = vld [vmem:[#allocation3 + $0x10] sm:$0xff]  ;;  %v1512_v33 = vld [vmem:[#allocation3 + $0x18] sm:$0xff] }
  0x3b   :  { %v1378_v51 = vld [vmem:[#allocation6 + $0x3d4] ss:$8 sps:$4 sm:$0xff]  }
  0x3c   :  { %871 = vmatpush2.bf16.msra.mxu0 %v1265_v34  ;;  %v1075_v34 = vcombine.high %v1510_v32, %v1510_v32 }
  0x3d   :  { %912 = vmatpush2.bf16.msra.mxu1 %v1266_v35  ;;  %872 = vmatprep.subr.bf16.mxu0 %v1267_v36  ;;  %v1077_v35 = vcombine.high %v1512_v33, %v1512_v33  ;;  %v1349_v36 = vld [vmem:[#allocation6 + $0x210] ss:$8 sps:$4 sm:$0xff]  }
  0x3e   :  { %913 = vmatprep.subr.bf16.mxu1 %v1269_v37  ;;  %v1352_v37 = vld [vmem:[#allocation6 + $0x310] ss:$8 sps:$4 sm:$0xff]  }
  0x40   :  { %873 = vmatpush2.bf16.msra.mxu0 %v1271_v38  ;;  %v1357_v38 = vld [vmem:[#allocation6 + $0x204] ss:$8 sps:$4 sm:$0xff]  }
  0x41   :  { %914 = vmatpush2.bf16.msra.mxu1 %v1272_v39  ;;  %874 = vmatprep.subr.bf16.mxu0 %v1273_v40  ;;  %v1360_v39 = vld [vmem:[#allocation6 + $0x304] ss:$8 sps:$4 sm:$0xff]   ;;  %v1355_v40 = vld [vmem:[#allocation6 + $0x200] ss:$8 sps:$4 sm:$0xff]  }
  0x42   :  { %915 = vmatprep.subr.bf16.mxu1 %v1275_v41  ;;  %v1358_v41 = vld [vmem:[#allocation6 + $0x300] ss:$8 sps:$4 sm:$0xff]  }
  0x44   :  { %875 = vmatpush2.bf16.msra.mxu0 %v1277_v42  ;;  %v1363_v42 = vld [vmem:[#allocation6 + $0x2f4] ss:$8 sps:$4 sm:$0xff]  }
  0x45   :  { %916 = vmatpush2.bf16.msra.mxu1 %v1278_v43  ;;  %876 = vmatprep.subr.bf16.mxu0 %v1279_v44  ;;  %v1366_v43 = vld [vmem:[#allocation6 + $0x3f4] ss:$8 sps:$4 sm:$0xff]   ;;  %v1361_v44 = vld [vmem:[#allocation6 + $0x2f0] ss:$8 sps:$4 sm:$0xff]  }
  0x46   :  { %917 = vmatprep.subr.bf16.mxu1 %v1281_v45  ;;  %v1364_v45 = vld [vmem:[#allocation6 + $0x3f0] ss:$8 sps:$4 sm:$0xff]  }
  0x48   :  { %877 = vmatpush2.bf16.msra.mxu0 %v1283_v49  ;;  %v1370_v49 = vld [vmem:[#allocation6 + $0x3e0] ss:$8 sps:$4 sm:$0xff]  }
  0x49   :  { %918 = vmatpush2.bf16.msra.mxu1 %v1284_v50  ;;  %878 = vmatprep.subr.bf16.mxu0 %v1285_v52  ;;  %v1375_v50 = vld [vmem:[#allocation6 + $0x2d4] ss:$8 sps:$4 sm:$0xff]   ;;  %v1373_v52 = vld [vmem:[#allocation6 + $0x2d0] ss:$8 sps:$4 sm:$0xff]  }
  0x4a   :  { %919 = vmatprep.subr.bf16.mxu1 %v1287_v53  ;;  %v1376_v53 = vld [vmem:[#allocation6 + $0x3d0] ss:$8 sps:$4 sm:$0xff]  }
  0x4c   :  { %879 = vmatpush2.bf16.msra.mxu0 %v1289_v54  ;;  %v1381_v54 = vld [vmem:[#allocation6 + $0x2c4] ss:$8 sps:$4 sm:$0xff]  }
  0x4d   :  { %920 = vmatpush2.bf16.msra.mxu1 %v1290_v55  ;;  %880 = vmatprep.subr.bf16.mxu0 %v1291_v56  ;;  %v1384_v55 = vld [vmem:[#allocation6 + $0x3c4] ss:$8 sps:$4 sm:$0xff]   ;;  %v1379_v56 = vld [vmem:[#allocation6 + $0x2c0] ss:$8 sps:$4 sm:$0xff]  }
  0x4e   :  { %921 = vmatprep.subr.bf16.mxu1 %v1293_v57  ;;  %v1382_v57 = vld [vmem:[#allocation6 + $0x3c0] ss:$8 sps:$4 sm:$0xff]  }
  0x50   :  { %881 = vmatpush2.bf16.msra.mxu0 %v1295_v58  ;;  %v1387_v58 = vld [vmem:[#allocation6 + $0x2b4] ss:$8 sps:$4 sm:$0xff]  }
  0x51   :  { %922 = vmatpush2.bf16.msra.mxu1 %v1296_v59  ;;  %882 = vmatprep.subr.bf16.mxu0 %v1297_v60  ;;  %v1390_v59 = vld [vmem:[#allocation6 + $0x3b4] ss:$8 sps:$4 sm:$0xff]   ;;  %v1385_v60 = vld [vmem:[#allocation6 + $0x2b0] ss:$8 sps:$4 sm:$0xff]  }
  0x52   :  { %923 = vmatprep.subr.bf16.mxu1 %v1299_v61  ;;  %v1388_v61 = vld [vmem:[#allocation6 + $0x3b0] ss:$8 sps:$4 sm:$0xff]  }
  0x54   :  { %883 = vmatpush2.bf16.msra.mxu0 %v1301_v62  ;;  %v1393_v62 = vld [vmem:[#allocation6 + $0x2a4] ss:$8 sps:$4 sm:$0xff]  }
  0x55   :  { %924 = vmatpush2.bf16.msra.mxu1 %v1302_v63  ;;  %884 = vmatprep.subr.bf16.mxu0 %v1303_v0  ;;  %v1396_v63 = vld [vmem:[#allocation6 + $0x3a4] ss:$8 sps:$4 sm:$0xff]   ;;  %v1391_v0 = vld [vmem:[#allocation6 + $0x2a0] ss:$8 sps:$4 sm:$0xff]  }
  0x56   :  { %925 = vmatprep.subr.bf16.mxu1 %v1305_v1  ;;  %v1394_v1 = vld [vmem:[#allocation6 + $0x3a0] ss:$8 sps:$4 sm:$0xff]  }
  0x58   :  { %885 = vmatpush2.bf16.msra.mxu0 %v1307_v2  ;;  %v1399_v2 = vld [vmem:[#allocation6 + $0x294] ss:$8 sps:$4 sm:$0xff]  }
  0x59   :  { %926 = vmatpush2.bf16.msra.mxu1 %v1308_v3  ;;  %936 = vmatprep.subr.bf16.mxu0 %v1315_v4  ;;  %v1402_v3 = vld [vmem:[#allocation6 + $0x394] ss:$8 sps:$4 sm:$0xff]   ;;  %v1397_v4 = vld [vmem:[#allocation6 + $0x290] ss:$8 sps:$4 sm:$0xff]  }
  0x5a   :  { %977 = vmatprep.subr.bf16.mxu1 %v1318_v5  ;;  %v1400_v5 = vld [vmem:[#allocation6 + $0x390] ss:$8 sps:$4 sm:$0xff]  }
  0x5b   :  { %887 = vmatmul.mubr.bf16.vlgmr.msra.gmra.mxu0 %v1070_v6  ;;  %v1405_v6 = vld [vmem:[#allocation6 + $0x284] ss:$8 sps:$4 sm:$0xff]  }
  0x5c   :  { %928 = vmatmul.mubr.bf16.vlgmr.msra.gmra.mxu1 %v1072_v7  ;;  %937 = vmatpush1.bf16.msra.mxu0 %v1313_v8  ;;  %v1408_v7 = vld [vmem:[#allocation6 + $0x384] ss:$8 sps:$4 sm:$0xff]   ;;  %v1403_v8 = vld [vmem:[#allocation6 + $0x280] ss:$8 sps:$4 sm:$0xff]  }
  0x5d   :  { %978 = vmatpush1.bf16.msra.mxu1 %v1316_v9  ;;  %938 = vmatprep.subr.bf16.mxu0 %v1321_v10  ;;  %v1406_v9 = vld [vmem:[#allocation6 + $0x380] ss:$8 sps:$4 sm:$0xff]   ;;  %v1074_v10 = vcombine.low %v1510_v32, %v1510_v32 }
  0x5e   :  { %979 = vmatprep.subr.bf16.mxu1 %v1324_v11  ;;  %968 = vmatprep.mubr.bf16.mxu0 %v1075_v34  ;;  %v1076_v11 = vcombine.low %v1512_v33, %v1512_v33 }
  0x5f   :  { %1009 = vmatprep.mubr.bf16.mxu1 %v1077_v35 }
  0x60   :  { %939 = vmatpush1.bf16.msra.mxu0 %v1319_v12 }
  0x61   :  { %980 = vmatpush1.bf16.msra.mxu1 %v1322_v13  ;;  %940 = vmatprep.subr.bf16.mxu0 %v1327_v14 }
  0x62   :  { %981 = vmatprep.subr.bf16.mxu1 %v1330_v15 }
  0x64   :  { %941 = vmatpush1.bf16.msra.mxu0 %v1325_v16 }
  0x65   :  { %982 = vmatpush1.bf16.msra.mxu1 %v1328_v17  ;;  %942 = vmatprep.subr.bf16.mxu0 %v1333_v18 }
  0x66   :  { %983 = vmatprep.subr.bf16.mxu1 %v1336_v19 }
  0x68   :  { %943 = vmatpush1.bf16.msra.mxu0 %v1331_v20 }
  0x69   :  { %984 = vmatpush1.bf16.msra.mxu1 %v1334_v21  ;;  %944 = vmatprep.subr.bf16.mxu0 %v1339_v22  ;;  %v1029_v21 = vlaneseq }
  0x6a   :  { %985 = vmatprep.subr.bf16.mxu1 %v1342_v23 }
  0x6b   :  { %v1030_v22 = vshrl.u32 %v1029_v21, 7 }
  0x6c   :  { %945 = vmatpush1.bf16.msra.mxu0 %v1337_v24  ;;  %v1027_v24 = vld [vmem:[%s1530_s2] sm:$0x3]  ;;  %s1058_s2 = sshll.u32 %s1483_s24, 4  ;;  %s1059_s2 = int_to_ptr.vmem [resolvable:$true] %s1058_s2 }
  0x6d   :  { %986 = vmatpush1.bf16.msra.mxu1 %v1340_v25  ;;  %946 = vmatprep.subr.bf16.mxu0 %v1345_v26  ;;  %v1031_v23 = vsub.s32 0, %v1030_v22  ;;  %v1035_v25 = vsub.s32 1, %v1030_v22  ;;  %s1453_s25 = scalar_lea.vmem %s1059_s2, 128  ;;  %p1458_p11 = scmp.lt.s32.totalorder %s1059_s2, %s1059_s2 }
  0x6e   :  { %987 = vmatprep.subr.bf16.mxu1 %v1348_v27  ;;  %p1454_p10 = scmp.ne.s32.totalorder %s1059_s2, %s1453_s25  ;;  %p1459_p12 = scmp.lt.s32.totalorder %s1453_s25, %s1453_s25 }
  0x6f   :  { %v1036_v35 = vrot.slane %v1027_v24, %v1035_v25 }
  0x70   :  { %947 = vmatpush1.bf16.msra.mxu0 %v1343_v28  ;;  %p1460_p13 = por %p1459_p12, %p1458_p11 }
  0x71   :  { %988 = vmatpush1.bf16.msra.mxu1 %v1346_v29  ;;  %948 = vmatprep.subr.bf16.mxu0 %v1351_v30  ;;  %v1032_v30 = vrot.slane %v1027_v24, %v1031_v23 }
  0x72   :  { %989 = vmatprep.subr.bf16.mxu1 %v1354_v31  ;;  %p1461_p0 = pnand %p1460_p13, %p1454_p10 }
  0x74   :  { %949 = vmatpush1.bf16.msra.mxu0 %v1349_v36 }
  0x75   :  { %990 = vmatpush1.bf16.msra.mxu1 %v1352_v37  ;;  %950 = vmatprep.subr.bf16.mxu0 %v1357_v38 }
  0x76   :  { %991 = vmatprep.subr.bf16.mxu1 %v1360_v39 }
  0x78   :  { %951 = vmatpush1.bf16.msra.mxu0 %v1355_v40 }
  0x79   :  { %992 = vmatpush1.bf16.msra.mxu1 %v1358_v41  ;;  %952 = vmatprep.subr.bf16.mxu0 %v1363_v42 }
  0x7a   :  { %993 = vmatprep.subr.bf16.mxu1 %v1366_v43 }
  0x7c   :  { %953 = vmatpush2.bf16.msra.mxu0 %v1361_v44 }
  0x7d   :  { %994 = vmatpush2.bf16.msra.mxu1 %v1364_v45  ;;  %954 = vmatprep.subr.bf16.mxu0 %v1369_v46 }
  0x7e   :  { %995 = vmatprep.subr.bf16.mxu1 %v1372_v47 }
  0x80   :  { %955 = vmatpush2.bf16.msra.mxu0 %v1367_v48 }
  0x81   :  { %996 = vmatpush2.bf16.msra.mxu1 %v1370_v49  ;;  %956 = vmatprep.subr.bf16.mxu0 %v1375_v50 }
  0x82   :  { %997 = vmatprep.subr.bf16.mxu1 %v1378_v51 }
  0x84   :  { %957 = vmatpush2.bf16.msra.mxu0 %v1373_v52 }
  0x85   :  { %998 = vmatpush2.bf16.msra.mxu1 %v1376_v53  ;;  %958 = vmatprep.subr.bf16.mxu0 %v1381_v54 }
  0x86   :  { %999 = vmatprep.subr.bf16.mxu1 %v1384_v55 }
  0x88   :  { %959 = vmatpush2.bf16.msra.mxu0 %v1379_v56 }
  0x89   :  { %1000 = vmatpush2.bf16.msra.mxu1 %v1382_v57  ;;  %960 = vmatprep.subr.bf16.mxu0 %v1387_v58 }
  0x8a   :  { %1001 = vmatprep.subr.bf16.mxu1 %v1390_v59 }
  0x8c   :  { %961 = vmatpush2.bf16.msra.mxu0 %v1385_v60 }
  0x8d   :  { %1002 = vmatpush2.bf16.msra.mxu1 %v1388_v61  ;;  %962 = vmatprep.subr.bf16.mxu0 %v1393_v62 }
  0x8e   :  { %1003 = vmatprep.subr.bf16.mxu1 %v1396_v63 }
  0x90   :  { %963 = vmatpush2.bf16.msra.mxu0 %v1391_v0 }
  0x91   :  { %1004 = vmatpush2.bf16.msra.mxu1 %v1394_v1  ;;  %964 = vmatprep.subr.bf16.mxu0 %v1399_v2 }
  0x92   :  { %1005 = vmatprep.subr.bf16.mxu1 %v1402_v3 }
  0x94   :  { %965 = vmatpush2.bf16.msra.mxu0 %v1397_v4 }
  0x95   :  { %1006 = vmatpush2.bf16.msra.mxu1 %v1400_v5  ;;  %966 = vmatprep.subr.bf16.mxu0 %v1405_v6 }
  0x96   :  { %1007 = vmatprep.subr.bf16.mxu1 %v1408_v7 }
  0x98   :  { %967 = vmatpush2.bf16.msra.mxu0 %v1403_v8 }
  0x99   :  { %1008 = vmatpush2.bf16.msra.mxu1 %v1406_v9 }
  0x9b   :  { %969 = vmatmul.mubr.bf16.vlgmr.msra.gmra.mxu0 %v1074_v10 }
  0x9c   :  { %1010 = vmatmul.mubr.bf16.vlgmr.msra.gmra.mxu1 %v1076_v11 }
 0x11b   :  { %v888_v12 = vpop.f32.mrf.mxu0 }
 0x11c   :  { %v929_v13 = vpop.f32.mrf.mxu1 }
 0x11d   :  { %v930_v14 = vadd.f32 %v929_v13, %v888_v12  ;;  %v890_v15 = vpop.f32.mrf.mxu0 }
 0x11e   :  { %v931_v16 = vpop.f32.mrf.mxu1 }
 0x11f   :  { %v892_v17 = vpop.f32.mrf.mxu0  ;;  %v932_v28 = vadd.f32 %v931_v16, %v890_v15 }
 0x120   :  { %v933_v18 = vpop.f32.mrf.mxu1 }
 0x121   :  { %v893_v19 = vpop.f32.mrf.mxu0 }
 0x122   :  { %v934_v20 = vpop.f32.mrf.mxu1 }
 0x15b   :  { %v970_v26 = vpop.f32.mrf.mxu0 }
 0x15c   :  { %v1011_v27 = vpop.f32.mrf.mxu1  ;;  %v971_v29 = vadd.f32 %v970_v26, %v930_v14 }
 0x15d   :  { %v972_v31 = vpop.f32.mrf.mxu0 }
 0x15e   :  { %v1013_v32 = vpop.f32.mrf.mxu1  ;;  %v1012_v33 = vadd.f32 %v1011_v27, %v971_v29  ;;  %v973_v34 = vadd.f32 %v972_v31, %v932_v28 }
 0x15f   :  { %v974_v36 = vpop.f32.mrf.mxu0 }
 0x160   :  { %v1015_v37 = vpop.f32.mrf.mxu1  ;;  %v1039_v38 = vadd.f32 %v1032_v30, %v1012_v33  ;;  %v1014_v39 = vadd.f32 %v1013_v32, %v973_v34 }
 0x161   :  { %v975_v40 = vpop.f32.mrf.mxu0 }
 0x162   :  { %v1016_v41 = vpop.f32.mrf.mxu1  ;;  %v1040_v42 = vadd.f32 %v1036_v35, %v1014_v39  ;;  %v1041_v43 = vmax.f32 %v1039_v38, 0.0 }
 0x164   :  { %v1042_v44 = vmax.f32 %v1040_v42, 0.0 }
 0x166   :  { %v1207_v45 = vpack.c.bf16 %v1042_v44, %v1041_v43 }
 0x168   :  { %1051 = vst [vmem:[#allocation8] sm:$0xff] %v1207_v45 }
 0x169   :  { %1464 = shalt.err (!%p1461_p0)
}
 0x16a   :  { %1061 = dma.vmem_to_hbm [thread:$0]  %s1059_s2, 128, %s1531_s3, [#allocation5]  }
 0x16b   :  { %1477 = dma.done.wait [#allocation5], 128  }
 0x16c   :  { %1478 = vsyncadd [#allocation5], 4294967168 }
 0x16d   :  { %1065 = vsyncpa [#allocation4], 1 }
 0x16e   :  { %1066 = vsyncpa [#allocation7], 1 }
 0x16f   :  { %1067 = vsyncpa [#allocation5], 1 }

</bundles_post_ra>
